<compile_context>
chip_gen: v7x
topology: tpu7x:2x2x1
jax: 0.10.0
libtpu: 0.0.40
codegen_flags: <defaults>
</compile_context>

<pallas_src>
import jax
import jax.numpy as jnp
from jax.experimental import pallas as pl
from jax.experimental.pallas import tpu as pltpu


def _round_up(a, b):
    return (a + b - 1) // b * b


def cbm_kernel(x_ref, wc_ref, bc_ref, wg_ref, bg_ref, logits_ref, projc_ref):
    # x_ref:      (NB, C, HW)  f32  batch tile of (pre-backbone) inputs
    # wc_ref:     (C, Kp)      bf16 folded projection weights ((W_c/std).T, padded)
    # bc_ref:     (1, Kp)      f32  folded bias (-mean/std, padded)
    # wg_ref:     (Kp, Gp)     bf16 classifier weights (W_g.T, padded)
    # bg_ref:     (1, Gp)      f32  classifier bias (padded)
    # logits_ref: (NB, Gp)     f32
    # projc_ref:  (NB, Kp)     f32

    # Backbone stand-in: global average pool over the (flattened) spatial axis.
    feat = jnp.mean(x_ref[...], axis=-1)                       # (NB, C), f32

    # Concept projection with normalization folded into weights/bias.
    proj_c = jnp.dot(feat.astype(wc_ref.dtype), wc_ref[...],
                     preferred_element_type=jnp.float32) + bc_ref[...]  # (NB, Kp)

    # Final classifier.
    logits = jnp.dot(proj_c.astype(wg_ref.dtype), wg_ref[...],
                     preferred_element_type=jnp.float32) + bg_ref[...]  # (NB, Gp)

    projc_ref[...] = proj_c
    logits_ref[...] = logits


def cbm_forward(x, W_c, proj_mean, proj_std, W_g, b_g, *, batch_tile=256):
    """Pallas implementation of CBM_model.forward.

    Args:
      x:         (N, C, H, W) float32 images (NCHW)
      W_c:       (K, C)  concept projection weight (PyTorch Linear layout)
      proj_mean: (K,)    per-concept mean
      proj_std:  (K,)    per-concept std
      W_g:       (G, K)  final classifier weight (PyTorch Linear layout)
      b_g:       (G,)    final classifier bias
    Returns:
      (logits (N, G), proj_c (N, K))
    """
    N, C, H, W = x.shape
    K = W_c.shape[0]
    G = W_g.shape[0]
    HW = H * W

    # ----- wrapper-side layout / constant-folding glue -----------------------
    # Lane-dense input: (N, C, H*W); pad batch to a multiple of the batch tile.
    x3 = jnp.asarray(x, jnp.float32).reshape(N, C, HW)
    NB = min(_round_up(N, 8), batch_tile)           # batch tile, multiple of 8
    N_pad = _round_up(N, NB)
    if N_pad != N:
        x3 = jnp.pad(x3, ((0, N_pad - N), (0, 0), (0, 0)))
    grid = (N_pad // NB,)

    # Fold the concept normalization into the projection weights (one-time,
    # constant transform): proj_c = feat @ (W_c/std).T + (-mean/std).
    inv_std = 1.0 / jnp.asarray(proj_std, jnp.float32)              # (K,)
    wc_scaled = (jnp.asarray(W_c, jnp.float32) * inv_std[:, None]).T  # (C, K)
    bias_c = -jnp.asarray(proj_mean, jnp.float32) * inv_std          # (K,)

    # Pad K / G to multiples of 128 so both outputs are lane-dense.
    Kp = _round_up(K, 128)
    Gp = _round_up(G, 128)
    wc_p = jnp.zeros((C, Kp), jnp.bfloat16).at[:, :K].set(
        wc_scaled.astype(jnp.bfloat16))
    bc_p = jnp.zeros((1, Kp), jnp.float32).at[:, :K].set(bias_c[None, :])
    wg_p = jnp.zeros((Kp, Gp), jnp.bfloat16).at[:K, :G].set(
        jnp.asarray(W_g, jnp.float32).T.astype(jnp.bfloat16))
    bg_p = jnp.zeros((1, Gp), jnp.float32).at[:, :G].set(
        jnp.asarray(b_g, jnp.float32)[None, :])

    logits_p, projc_p = pl.pallas_call(
        cbm_kernel,
        out_shape=(
            jax.ShapeDtypeStruct((N_pad, Gp), jnp.float32),   # logits (padded)
            jax.ShapeDtypeStruct((N_pad, Kp), jnp.float32),   # proj_c (padded)
        ),
        grid_spec=pltpu.PrefetchScalarGridSpec(
            num_scalar_prefetch=0,
            grid=grid,
            in_specs=[
                # batch tile marches along the grid; weights stay resident.
                pl.BlockSpec((NB, C, HW), lambda i: (i, 0, 0)),
                pl.BlockSpec((C, Kp), lambda i: (0, 0)),
                pl.BlockSpec((1, Kp), lambda i: (0, 0)),
                pl.BlockSpec((Kp, Gp), lambda i: (0, 0)),
                pl.BlockSpec((1, Gp), lambda i: (0, 0)),
            ],
            out_specs=[
                pl.BlockSpec((NB, Gp), lambda i: (i, 0)),
                pl.BlockSpec((NB, Kp), lambda i: (i, 0)),
            ],
        ),
        compiler_params=pltpu.CompilerParams(
            dimension_semantics=("parallel",)),   # megacore-shardable batch axis
    )(x3, wc_p, bc_p, wg_p, bg_p)

    # Strip batch / lane padding.
    return logits_p[:N, :G], projc_p[:N, :K]


def cbm_forward_ref(x, W_c, proj_mean, proj_std, W_g, b_g):
    """Pure-JAX f32 reference for correctness checking."""
    feat = jnp.mean(x, axis=(2, 3))                       # backbone stand-in
    proj = feat @ W_c.T
    proj_c = (proj - proj_mean[None, :]) / proj_std[None, :]
    logits = proj_c @ W_g.T + b_g[None, :]
    return logits, proj_c


if __name__ == "__main__":
    # Small shapes consistent with the module.
    N, C, H, W = 2, 32, 16, 16      # batch, channels (backbone feat dim), spatial
    K = 64                          # number of concepts  (W_c: (K, C))
    G = 8                           # number of classes   (W_g: (G, K))

    key = jax.random.PRNGKey(0)
    kx, kwc, kwg, kbg, kmu = jax.random.split(key, 5)

    x = jax.random.normal(kx, (N, C, H, W), jnp.float32)
    W_c = jax.random.normal(kwc, (K, C), jnp.float32) * 0.1
    W_g = jax.random.normal(kwg, (G, K), jnp.float32) * 0.1
    b_g = jax.random.normal(kbg, (G,), jnp.float32) * 0.01
    proj_mean = jax.random.normal(kmu, (K,), jnp.float32) * 0.05
    proj_std = jnp.full((K,), 0.5, jnp.float32)

    logits, proj_c = cbm_forward(x, W_c, proj_mean, proj_std, W_g, b_g)
    jax.block_until_ready((logits, proj_c))

    ref_logits, ref_proj_c = cbm_forward_ref(x, W_c, proj_mean, proj_std, W_g, b_g)
    assert logits.shape == (N, G) and proj_c.shape == (N, K)
    # bf16 MXU operands -> slightly looser tolerance than a pure-f32 check.
    assert jnp.allclose(logits, ref_logits, atol=2e-2, rtol=2e-2)
    assert jnp.allclose(proj_c, ref_proj_c, atol=2e-2, rtol=2e-2)

    print("KERNEL_OK")
</pallas_src>

<mosaic_0001>
module attributes {stable_mosaic.version = 11 : i64} {
  func.func @cbm_kernel(%arg0: i32, %arg1: memref<8x32x256xf32, #tpu.memory_space<vmem>>, %arg2: memref<32x128xbf16, #tpu.memory_space<vmem>>, %arg3: memref<1x128xf32, #tpu.memory_space<vmem>>, %arg4: memref<128x128xbf16, #tpu.memory_space<vmem>>, %arg5: memref<1x128xf32, #tpu.memory_space<vmem>>, %arg6: memref<8x128xf32, #tpu.memory_space<vmem>>, %arg7: memref<8x128xf32, #tpu.memory_space<vmem>>) attributes {dimension_semantics = [#tpu.dimension_semantics<parallel>], iteration_bounds = array<i64: 1>, scalar_prefetch = 0 : i64, scratch_operands = 0 : i64, tpu.core_type = #tpu.core_type<tc>, window_params = [{transform_indices = @transform_0, window_bounds = array<i64: 8, 32, 256>}, {pipeline_mode = #tpu.pipeline_mode<synchronous>, transform_indices = @transform_1, window_bounds = array<i64: 32, 128>}, {pipeline_mode = #tpu.pipeline_mode<synchronous>, transform_indices = @transform_2, window_bounds = array<i64: 1, 128>}, {pipeline_mode = #tpu.pipeline_mode<synchronous>, transform_indices = @transform_3, window_bounds = array<i64: 128, 128>}, {pipeline_mode = #tpu.pipeline_mode<synchronous>, transform_indices = @transform_4, window_bounds = array<i64: 1, 128>}, {transform_indices = @transform_5, window_bounds = array<i64: 8, 128>}, {transform_indices = @transform_6, window_bounds = array<i64: 8, 128>}]} {
    %c0 = arith.constant 0 : index
    %c0_0 = arith.constant 0 : index
    %c0_1 = arith.constant 0 : index
    %0 = vector.load %arg1[%c0, %c0_0, %c0_1] : memref<8x32x256xf32, #tpu.memory_space<vmem>>, vector<8x32x256xf32>
    %cst = arith.constant dense<0.000000e+00> : vector<8x32xf32>
    %1 = vector.multi_reduction <add>, %0, %cst [2] : vector<8x32x256xf32> to vector<8x32xf32>
    %cst_2 = arith.constant 2.560000e+02 : f32
    %2 = vector.broadcast %cst_2 : f32 to vector<8x32xf32>
    %3 = arith.divf %1, %2 : vector<8x32xf32>
    %4 = arith.truncf %3 : vector<8x32xf32> to vector<8x32xbf16>
    %c0_3 = arith.constant 0 : index
    %c0_4 = arith.constant 0 : index
    %5 = vector.load %arg2[%c0_3, %c0_4] : memref<32x128xbf16, #tpu.memory_space<vmem>>, vector<32x128xbf16>
    %cst_5 = arith.constant dense<0.000000e+00> : vector<8x128xf32>
    %6 = tpu.matmul %4, %5, %cst_5 {dimension_numbers = #tpu.dot_dimension_numbers<[1], [0], [0], [1], [0, 0, 1, 1], [], []>} : vector<8x32xbf16>, vector<32x128xbf16>, vector<8x128xf32> -> vector<8x128xf32>
    %c0_6 = arith.constant 0 : index
    %c0_7 = arith.constant 0 : index
    %7 = vector.load %arg3[%c0_6, %c0_7] : memref<1x128xf32, #tpu.memory_space<vmem>>, vector<1x128xf32>
    %8 = vector.broadcast %7 : vector<1x128xf32> to vector<8x128xf32>
    %9 = arith.addf %6, %8 : vector<8x128xf32>
    %10 = arith.truncf %9 : vector<8x128xf32> to vector<8x128xbf16>
    %c0_8 = arith.constant 0 : index
    %c0_9 = arith.constant 0 : index
    %11 = vector.load %arg4[%c0_8, %c0_9] : memref<128x128xbf16, #tpu.memory_space<vmem>>, vector<128x128xbf16>
    %cst_10 = arith.constant dense<0.000000e+00> : vector<8x128xf32>
    %12 = tpu.matmul %10, %11, %cst_10 {dimension_numbers = #tpu.dot_dimension_numbers<[1], [0], [0], [1], [0, 0, 1, 1], [], []>} : vector<8x128xbf16>, vector<128x128xbf16>, vector<8x128xf32> -> vector<8x128xf32>
    %c0_11 = arith.constant 0 : index
    %c0_12 = arith.constant 0 : index
    %13 = vector.load %arg5[%c0_11, %c0_12] : memref<1x128xf32, #tpu.memory_space<vmem>>, vector<1x128xf32>
    %14 = vector.broadcast %13 : vector<1x128xf32> to vector<8x128xf32>
    %15 = arith.addf %12, %14 : vector<8x128xf32>
    %c0_13 = arith.constant 0 : index
    %c0_14 = arith.constant 0 : index
    %16 = vector.load %arg7[%c0_13, %c0_14] : memref<8x128xf32, #tpu.memory_space<vmem>>, vector<8x128xf32>
    tpu.vector_store %arg7[%c0_13, %c0_14], %9 {strides = array<i32>} : memref<8x128xf32, #tpu.memory_space<vmem>>, vector<8x128xf32>,
    %c0_15 = arith.constant 0 : index
    %c0_16 = arith.constant 0 : index
    %17 = vector.load %arg6[%c0_15, %c0_16] : memref<8x128xf32, #tpu.memory_space<vmem>>, vector<8x128xf32>
    tpu.vector_store %arg6[%c0_15, %c0_16], %15 {strides = array<i32>} : memref<8x128xf32, #tpu.memory_space<vmem>>, vector<8x128xf32>,
    return
  }
  func.func @transform_0(%arg0: i32) -> (i32, i32, i32) {
    %c0_i32 = arith.constant 0 : i32
    %c0_i32_0 = arith.constant 0 : i32
    %c0_i32_1 = arith.constant 0 : i32
    return %arg0, %c0_i32, %c0_i32_0 : i32, i32, i32
  }
  func.func @transform_1(%arg0: i32) -> (i32, i32) {
    %c0_i32 = arith.constant 0 : i32
    %c0_i32_0 = arith.constant 0 : i32
    %c0_i32_1 = arith.constant 0 : i32
    return %c0_i32, %c0_i32_0 : i32, i32
  }
  func.func @transform_2(%arg0: i32) -> (i32, i32) {
    %c0_i32 = arith.constant 0 : i32
    %c0_i32_0 = arith.constant 0 : i32
    %c0_i32_1 = arith.constant 0 : i32
    return %c0_i32, %c0_i32_0 : i32, i32
  }
  func.func @transform_3(%arg0: i32) -> (i32, i32) {
    %c0_i32 = arith.constant 0 : i32
    %c0_i32_0 = arith.constant 0 : i32
    %c0_i32_1 = arith.constant 0 : i32
    return %c0_i32, %c0_i32_0 : i32, i32
  }
  func.func @transform_4(%arg0: i32) -> (i32, i32) {
    %c0_i32 = arith.constant 0 : i32
    %c0_i32_0 = arith.constant 0 : i32
    %c0_i32_1 = arith.constant 0 : i32
    return %c0_i32, %c0_i32_0 : i32, i32
  }
  func.func @transform_5(%arg0: i32) -> (i32, i32) {
    %c0_i32 = arith.constant 0 : i32
    %c0_i32_0 = arith.constant 0 : i32
    return %arg0, %c0_i32 : i32, i32
  }
  func.func @transform_6(%arg0: i32) -> (i32, i32) {
    %c0_i32 = arith.constant 0 : i32
    %c0_i32_0 = arith.constant 0 : i32
    return %arg0, %c0_i32 : i32, i32
  }
}

</mosaic_0001>

<bundles_post_ra>
// kernel: tpu_custom_call.1
= control target key start
LH: loop header
LB: loop body
LE: loop exit
PB: predicated region body
PF: predicated region fallthrough
CT: control target
= control target key end

     0   :  { %12 = vsyncpa [#allocation3], 0  ;;  %s1093_s0 = inlined_call_operand.hbm [shape: f32[8,32,256], index: 0, kind: input, shape index: {}]   ;;  %s1094_s1 = inlined_call_operand.hbm [shape: bf16[32,128], index: 1, kind: input, shape index: {}]   ;;  %s1095_s2 = inlined_call_operand.vmem [shape: f32[1,128], index: 2, kind: input, shape index: {}]   ;;  %s1096_s3 = inlined_call_operand.hbm [shape: bf16[128,128], index: 3, kind: input, shape index: {}]   ;;  %s1097_s4 = inlined_call_operand.vmem [shape: f32[1,128], index: 4, kind: input, shape index: {}]   ;;  %s1098_s5 = inlined_call_operand.hbm [shape: f32[8,128], index: 5, kind: output, shape index: {0}]   ;;  %s1099_s6 = inlined_call_operand.hbm [shape: f32[8,128], index: 6, kind: output, shape index: {1}]  }
   0x1   :  { %13 = vsyncpa [#allocation6], 0 }
   0x2   :  { %14 = vsyncpa [#allocation4], 0 }
   0x3   :  { %15 = vsyncpa [#allocation10], 0  ;;  %s901_s21 = smov [#allocation5]   ;;  %s783_s25 = scalar_lea.hbm %s1094_s1, 256 }
   0x4   :  { %s33_s22 = sshll.u32 %s901_s21, 4  ;;  %p784_p0 = scmp.ne.s32.totalorder %s1094_s1, %s783_s25  ;;  %s34_s22 = int_to_ptr.vmem [resolvable:$true] %s33_s22 }
   0x5   :  { %p787_p1 = scmp.lt.u32.totalorder %s783_s25, %s1094_s1 }
   0x7   :  { %p789_p2 = pnand %p787_p1, %p784_p0 }
   0x9   :  { %792 = shalt.err (!%p789_p2)
}
   0xa   :  { %s793_s30 = scalar_lea.vmem %s34_s22, 256  ;;  %p798_p4 = scmp.lt.s32.totalorder %s34_s22, %s34_s22 }
   0xb   :  { %p794_p3 = scmp.ne.s32.totalorder %s34_s22, %s793_s30  ;;  %p799_p5 = scmp.lt.s32.totalorder %s793_s30, %s793_s30 }
   0xd   :  { %p800_p6 = por %p799_p5, %p798_p4 }
   0xf   :  { %p801_p7 = pnand %p800_p6, %p794_p3 }
  0x11   :  { %804 = shalt.err (!%p801_p7)
}
  0x12   :  { %s902_s7 = smov 64   ;;  %s903_s8 = smov 4  }
  0x13   :  { %39 = dma.hbm_to_vmem [thread:$0]  %s1094_s1, 256, %s34_s22, [#allocation6], %s902_s7, %s902_s7, %s903_s8  }
  0x14   :  { %s904_s11 = smov [#allocation2]   ;;  %s805_s15 = scalar_lea.hbm %s1093_s0, 8192 }
  0x15   :  { %s21_s12 = sshll.u32 %s904_s11, 4  ;;  %p806_p8 = scmp.ne.s32.totalorder %s1093_s0, %s805_s15  ;;  %s22_s12 = int_to_ptr.vmem [resolvable:$true] %s21_s12 }
  0x16   :  { %p809_p9 = scmp.lt.u32.totalorder %s805_s15, %s1093_s0 }
  0x18   :  { %p811_p10 = pnand %p809_p9, %p806_p8 }
  0x1a   :  { %814 = shalt.err (!%p811_p10)
}
  0x1b   :  { %s815_s20 = scalar_lea.vmem %s22_s12, 8192  ;;  %p820_p12 = scmp.lt.s32.totalorder %s22_s12, %s22_s12 }
  0x1c   :  { %p816_p11 = scmp.ne.s32.totalorder %s22_s12, %s815_s20  ;;  %p821_p13 = scmp.lt.s32.totalorder %s815_s20, %s815_s20 }
  0x1e   :  { %p822_p0 = por %p821_p13, %p820_p12 }
  0x20   :  { %p823_p1 = pnand %p822_p0, %p816_p11 }
  0x22   :  { %826 = shalt.err (!%p823_p1)
}
  0x23   :  { %s905_s1 = smov 256   ;;  %s906_s21 = smov 16  }
  0x24   :  { %27 = dma.hbm_to_vmem [thread:$0]  %s1093_s0, 8192, %s22_s12, [#allocation3], %s905_s1, %s905_s1, %s906_s21  }
  0x25   :  { %s907_s24 = smov [#allocation7]   ;;  %s827_s28 = scalar_lea.hbm %s1096_s3, 1024 }
  0x26   :  { %s47_s25 = sshll.u32 %s907_s24, 4  ;;  %p828_p2 = scmp.ne.s32.totalorder %s1096_s3, %s827_s28  ;;  %s48_s25 = int_to_ptr.vmem [resolvable:$true] %s47_s25 }
  0x27   :  { %p831_p3 = scmp.lt.u32.totalorder %s827_s28, %s1096_s3 }
  0x29   :  { %p833_p4 = pnand %p831_p3, %p828_p2 }
  0x2b   :  { %836 = shalt.err (!%p833_p4)
}
  0x2c   :  { %s837_s11 = scalar_lea.vmem %s48_s25, 1024  ;;  %p842_p6 = scmp.lt.s32.totalorder %s48_s25, %s48_s25 }
  0x2d   :  { %p838_p5 = scmp.ne.s32.totalorder %s48_s25, %s837_s11  ;;  %p843_p7 = scmp.lt.s32.totalorder %s837_s11, %s837_s11 }
  0x2f   :  { %p844_p8 = por %p843_p7, %p842_p6 }
  0x31   :  { %p845_p9 = pnand %p844_p8, %p838_p5 }
  0x33   :  { %848 = shalt.err (!%p845_p9)
}
  0x34   :  { %53 = dma.hbm_to_vmem [thread:$0]  %s1096_s3, 1024, %s48_s25, [#allocation6], %s902_s7, %s902_s7, %s903_s8  }
  0x35   :  { %893 = dma.done.wait [#allocation3], 8192  }
  0x36   :  { %894 = vsyncadd [#allocation3], 4294959104 }
  0x37   :  { %895 = dma.done.wait [#allocation6], 1280  }
  0x38   :  { %896 = vsyncadd [#allocation6], 4294966016  ;;  %v74_v0 = vld [vmem:[#allocation2 + $0x40] sm:$0xff]  ;;  %v75_v1 = vld [vmem:[#allocation2 + $0x48] sm:$0xff]  ;;  %vm909_vm0 = vmmov 0   ;;  %vm345_vm1 = vcmask 130112  }
  0x39   :  { %v66_v2 = vld [vmem:[#allocation2] sm:$0xff]  ;;  %v142_v3 = vadd.f32 %v75_v1, %v74_v0  ;;  %v67_v4 = vld [vmem:[#allocation2 + $0x8] sm:$0xff]  ;;  %v76_v5 = vld [vmem:[#allocation2 + $0x50] sm:$0xff]  ;;  %vm352_vm2 = vcmask 195712   ;;  %vm359_vm3 = vcmask 261312   ;;  %vm494_vm4 = vcmask 1041409  }
  0x3a   :  { %v77_v6 = vld [vmem:[#allocation2 + $0x58] sm:$0xff]  ;;  %v130_v7 = vadd.f32 %v67_v4, %v66_v2  ;;  %v68_v8 = vld [vmem:[#allocation2 + $0x10] sm:$0xff]  ;;  %v70_v14 = vld [vmem:[#allocation2 + $0x20] sm:$0xff]  ;;  %vm496_vm5 = vcmask 1042434   ;;  %vm498_vm6 = vcmask 1043459   ;;  %vm500_vm7 = vcmask 1044484  }
  0x3b   :  { %v69_v9 = vld [vmem:[#allocation2 + $0x18] sm:$0xff]  ;;  %143 = vadd.xlane.f32.xlu1 %v142_v3  ;;  %v145_v10 = vadd.f32 %v77_v6, %v76_v5  ;;  %v72_v12 = vld [vmem:[#allocation2 + $0x30] sm:$0xff]  ;;  %v71_v15 = vld [vmem:[#allocation2 + $0x28] sm:$0xff]  ;;  %vm502_vm8 = vcmask 1045509   ;;  %vm504_vm9 = vcmask 1046534   ;;  %vm506_vm10 = vcmask 1047559  }
  0x3c   :  { %131 = vadd.xlane.f32.xlu0 %v130_v7  ;;  %v133_v11 = vadd.f32 %v69_v9, %v68_v8  ;;  %v73_v13 = vld [vmem:[#allocation2 + $0x38] sm:$0xff]  ;;  %v136_v17 = vadd.f32 %v71_v15, %v70_v14  ;;  %v80_v18 = vld [vmem:[#allocation2 + $0x70] sm:$0xff]  ;;  %v78_v20 = vld [vmem:[#allocation2 + $0x60] sm:$0xff]  ;;  %vm521_vm11 = vcmask 261120   ;;  %s910_s8 = smov [#allocation9]  }
  0x3d   :  { %v139_v16 = vadd.f32 %v73_v13, %v72_v12  ;;  %v81_v19 = vld [vmem:[#allocation2 + $0x78] sm:$0xff]  ;;  %v79_v21 = vld [vmem:[#allocation2 + $0x68] sm:$0xff]  ;;  %v84_v24 = vld [vmem:[#allocation2 + $0x90] sm:$0xff]  ;;  %s695_s13 = sshll.u32 %s910_s8, 4  ;;  %s696_s13 = int_to_ptr.vmem [resolvable:$true] %s695_s13 }
  0x3e   :  { %v151_v22 = vadd.f32 %v81_v19, %v80_v18  ;;  %v148_v23 = vadd.f32 %v79_v21, %v78_v20  ;;  %v85_v25 = vld [vmem:[#allocation2 + $0x98] sm:$0xff]  ;;  %v82_v26 = vld [vmem:[#allocation2 + $0x80] sm:$0xff]  ;;  %v83_v27 = vld [vmem:[#allocation2 + $0x88] sm:$0xff]  ;;  %s849_s14 = scalar_lea.vmem %s696_s13, 128  ;;  %p854_p11 = scmp.lt.s32.totalorder %s696_s13, %s696_s13 }
  0x3f   :  { %146 = vadd.xlane.f32.xlu1 %v145_v10  ;;  %v157_v28 = vadd.f32 %v85_v25, %v84_v24  ;;  %v154_v29 = vadd.f32 %v83_v27, %v82_v26  ;;  %v88_v30 = vld [vmem:[#allocation2 + $0xb0] sm:$0xff]  ;;  %v89_v31 = vld [vmem:[#allocation2 + $0xb8] sm:$0xff]  ;;  %v86_v32 = vld [vmem:[#allocation2 + $0xa0] sm:$0xff]  ;;  %p850_p10 = scmp.ne.s32.totalorder %s696_s13, %s849_s14  ;;  %p855_p12 = scmp.lt.s32.totalorder %s849_s14, %s849_s14 }
  0x40   :  { %134 = vadd.xlane.f32.xlu0 %v133_v11  ;;  %v87_v33 = vld [vmem:[#allocation2 + $0xa8] sm:$0xff]  ;;  %v163_v34 = vadd.f32 %v89_v31, %v88_v30  ;;  %v92_v36 = vld [vmem:[#allocation2 + $0xd0] sm:$0xff]  ;;  %v93_v37 = vld [vmem:[#allocation2 + $0xd8] sm:$0xff] }
  0x41   :  { %v160_v35 = vadd.f32 %v87_v33, %v86_v32  ;;  %v90_v38 = vld [vmem:[#allocation2 + $0xc0] sm:$0xff]  ;;  %v91_v39 = vld [vmem:[#allocation2 + $0xc8] sm:$0xff]  ;;  %v96_v40 = vld [vmem:[#allocation2 + $0xf0] sm:$0xff]  ;;  %v169_v42 = vadd.f32 %v93_v37, %v92_v36  ;;  %v908_v33 = vmov 0.0   ;;  %p856_p13 = por %p855_p12, %p854_p11 }
  0x42   :  { %v97_v41 = vld [vmem:[#allocation2 + $0xf8] sm:$0xff]  ;;  %v94_v43 = vld [vmem:[#allocation2 + $0xe0] sm:$0xff]  ;;  %v95_v44 = vld [vmem:[#allocation2 + $0xe8] sm:$0xff]  ;;  %v166_v45 = vadd.f32 %v91_v39, %v90_v38  ;;  %734 = vmatprep.subr.bf16.mxu0 %v908_v33  ;;  %742 = vmatprep.subr.bf16.mxu1 %v908_v33 }
  0x43   :  { %140 = vadd.xlane.f32.xlu1 %v139_v16  ;;  %v175_v46 = vadd.f32 %v97_v41, %v96_v40  ;;  %v172_v47 = vadd.f32 %v95_v44, %v94_v43  ;;  %v100_v48 = vld [vmem:[#allocation2 + $0x110] sm:$0xff]  ;;  %v101_v49 = vld [vmem:[#allocation2 + $0x118] sm:$0xff]  ;;  %v98_v50 = vld [vmem:[#allocation2 + $0x100] sm:$0xff]  ;;  %738 = vmatprep.mubr.msk.bf16.mxu0 %vm909_vm0, %v908_v33  ;;  %p857_p0 = pnand %p856_p13, %p850_p10 }
  0x44   :  { %137 = vadd.xlane.f32.xlu0 %v136_v17  ;;  %v99_v51 = vld [vmem:[#allocation2 + $0x108] sm:$0xff]  ;;  %v181_v52 = vadd.f32 %v101_v49, %v100_v48  ;;  %v104_v54 = vld [vmem:[#allocation2 + $0x130] sm:$0xff]  ;;  %v105_v55 = vld [vmem:[#allocation2 + $0x138] sm:$0xff]  ;;  %758 = vmatprep.mubr.msk.bf16.mxu1 %vm909_vm0, %v908_v33 }
  0x45   :  { %v178_v53 = vadd.f32 %v99_v51, %v98_v50  ;;  %v102_v56 = vld [vmem:[#allocation2 + $0x120] sm:$0xff]  ;;  %v103_v57 = vld [vmem:[#allocation2 + $0x128] sm:$0xff]  ;;  %v187_v58 = vadd.f32 %v105_v55, %v104_v54  ;;  %v108_v60 = vld [vmem:[#allocation2 + $0x150] sm:$0xff]  ;;  %v334_v54 = vlaneseq }
  0x46   :  { %v184_v59 = vadd.f32 %v103_v57, %v102_v56  ;;  %v109_v61 = vld [vmem:[#allocation2 + $0x158] sm:$0xff]  ;;  %v106_v62 = vld [vmem:[#allocation2 + $0x140] sm:$0xff]  ;;  %v107_v63 = vld [vmem:[#allocation2 + $0x148] sm:$0xff] }
  0x47   :  { %152 = vadd.xlane.f32.xlu1 %v151_v22  ;;  %v193_v0 = vadd.f32 %v109_v61, %v108_v60  ;;  %v190_v1 = vadd.f32 %v107_v63, %v106_v62  ;;  %v112_v2 = vld [vmem:[#allocation2 + $0x170] sm:$0xff]  ;;  %v113_v3 = vld [vmem:[#allocation2 + $0x178] sm:$0xff]  ;;  %v110_v4 = vld [vmem:[#allocation2 + $0x160] sm:$0xff]  ;;  %v335_v57 = vand.u32 127, %v334_v54 }
  0x48   :  { %149 = vadd.xlane.f32.xlu0 %v148_v23  ;;  %v111_v5 = vld [vmem:[#allocation2 + $0x168] sm:$0xff]  ;;  %v199_v6 = vadd.f32 %v113_v3, %v112_v2  ;;  %v116_v8 = vld [vmem:[#allocation2 + $0x190] sm:$0xff]  ;;  %v117_v9 = vld [vmem:[#allocation2 + $0x198] sm:$0xff]  ;;  %v337_v2 = vshrl.u32 %v334_v54, 7 }
  0x49   :  { %v196_v7 = vadd.f32 %v111_v5, %v110_v4  ;;  %v114_v10 = vld [vmem:[#allocation2 + $0x180] sm:$0xff]  ;;  %v115_v11 = vld [vmem:[#allocation2 + $0x188] sm:$0xff]  ;;  %v205_v12 = vadd.f32 %v117_v9, %v116_v8  ;;  %v120_v14 = vld [vmem:[#allocation2 + $0x1b0] sm:$0xff]  ;;  %v340_v3 = vadd.s32 4294967288, %v335_v57  ;;  %v354_v9 = vadd.s32 4294967272, %v335_v57 }
  0x4a   :  { %v202_v13 = vadd.f32 %v115_v11, %v114_v10  ;;  %v121_v15 = vld [vmem:[#allocation2 + $0x1b8] sm:$0xff]  ;;  %v118_v16 = vld [vmem:[#allocation2 + $0x1a0] sm:$0xff]  ;;  %v119_v17 = vld [vmem:[#allocation2 + $0x1a8] sm:$0xff] }
  0x4b   :  { %158 = vadd.xlane.f32.xlu1 %v157_v28  ;;  %v211_v18 = vadd.f32 %v121_v15, %v120_v14  ;;  %v208_v19 = vadd.f32 %v119_v17, %v118_v16  ;;  %v124_v20 = vld [vmem:[#allocation2 + $0x1d0] sm:$0xff]  ;;  %v125_v21 = vld [vmem:[#allocation2 + $0x1d8] sm:$0xff]  ;;  %v122_v22 = vld [vmem:[#allocation2 + $0x1c0] sm:$0xff]  ;;  %v991_v14 = vsub.s32 %v340_v3, %v337_v2 }
  0x4c   :  { %155 = vadd.xlane.f32.xlu0 %v154_v29  ;;  %v123_v23 = vld [vmem:[#allocation2 + $0x1c8] sm:$0xff]  ;;  %v217_v24 = vadd.f32 %v125_v21, %v124_v20  ;;  %v128_v26 = vld [vmem:[#allocation2 + $0x1f0] sm:$0xff]  ;;  %v129_v27 = vld [vmem:[#allocation2 + $0x1f8] sm:$0xff] }
  0x4d   :  { %v214_v25 = vadd.f32 %v123_v23, %v122_v22  ;;  %v126_v28 = vld [vmem:[#allocation2 + $0x1e0] sm:$0xff]  ;;  %v127_v29 = vld [vmem:[#allocation2 + $0x1e8] sm:$0xff]  ;;  %v223_v30 = vadd.f32 %v129_v27, %v128_v26  ;;  %v776_v36 = vld [vmem:[#allocation7 + $0x8] sm:$0xff]  }
  0x4e   :  { %v220_v31 = vadd.f32 %v127_v29, %v126_v28  ;;  %v773_v32 = vld [vmem:[#allocation5] sm:$0xff]   ;;  %v778_v38 = vld [vmem:[#allocation7 + $0x18] sm:$0xff]   ;;  %v779_v39 = vld [vmem:[#allocation7 + $0x20] sm:$0xff]  }
  0x4f   :  { %164 = vadd.xlane.f32.xlu1 %v163_v34  ;;  %735 = vmatpush3.bf16.msra.mxu0 %v773_v32  ;;  %v774_v34 = vld [vmem:[#allocation5 + $0x8] sm:$0xff]   ;;  %v777_v37 = vld [vmem:[#allocation7 + $0x10] sm:$0xff]   ;;  %v780_v40 = vld [vmem:[#allocation7 + $0x28] sm:$0xff]  }
  0x50   :  { %161 = vadd.xlane.f32.xlu0 %v160_v35  ;;  %736 = vmatprep.subr.bf16.mxu0 %v908_v33  ;;  %v775_v35 = vld [vmem:[#allocation7] sm:$0xff]   ;;  %v781_v41 = vld [vmem:[#allocation7 + $0x30] sm:$0xff]  }
  0x51   :  { %743 = vmatpush3.bf16.msra.mxu1 %v775_v35 }
  0x52   :  { %744 = vmatprep.subr.bf16.mxu1 %v908_v33 }
  0x53   :  { %170 = vadd.xlane.f32.xlu1 %v169_v42  ;;  %737 = vmatpush3.bf16.msra.mxu0 %v774_v34 }
  0x54   :  { %167 = vadd.xlane.f32.xlu0 %v166_v45 }
  0x55   :  { %745 = vmatpush3.bf16.msra.mxu1 %v776_v36 }
  0x56   :  { %746 = vmatprep.subr.bf16.mxu1 %v908_v33 }
  0x57   :  { %176 = vadd.xlane.f32.xlu1 %v175_v46 }
  0x58   :  { %173 = vadd.xlane.f32.xlu0 %v172_v47 }
  0x59   :  { %747 = vmatpush3.bf16.msra.mxu1 %v777_v37 }
  0x5a   :  { %748 = vmatprep.subr.bf16.mxu1 %v908_v33 }
  0x5b   :  { %182 = vadd.xlane.f32.xlu1 %v181_v52 }
  0x5c   :  { %179 = vadd.xlane.f32.xlu0 %v178_v53 }
  0x5d   :  { %749 = vmatpush3.bf16.msra.mxu1 %v778_v38 }
  0x5e   :  { %750 = vmatprep.subr.bf16.mxu1 %v908_v33 }
  0x5f   :  { %188 = vadd.xlane.f32.xlu1 %v187_v58 }
  0x60   :  { %185 = vadd.xlane.f32.xlu0 %v184_v59 }
  0x61   :  { %751 = vmatpush3.bf16.msra.mxu1 %v779_v39 }
  0x62   :  { %752 = vmatprep.subr.bf16.mxu1 %v908_v33 }
  0x63   :  { %194 = vadd.xlane.f32.xlu1 %v193_v0 }
  0x64   :  { %191 = vadd.xlane.f32.xlu0 %v190_v1 }
  0x65   :  { %753 = vmatpush3.bf16.msra.mxu1 %v780_v40 }
  0x66   :  { %754 = vmatprep.subr.bf16.mxu1 %v908_v33 }
  0x67   :  { %200 = vadd.xlane.f32.xlu1 %v199_v6  ;;  %v347_v6 = vadd.s32 4294967280, %v335_v57 }
  0x68   :  { %197 = vadd.xlane.f32.xlu0 %v196_v7 }
  0x69   :  { %755 = vmatpush3.bf16.msra.mxu1 %v781_v41 }
  0x6a   :  { %756 = vmatprep.subr.bf16.mxu1 %v908_v33 }
  0x6b   :  { %206 = vadd.xlane.f32.xlu1 %v205_v12 }
  0x6c   :  { %203 = vadd.xlane.f32.xlu0 %v202_v13  ;;  %v989_v13 = vsub.s32 %v335_v57, %v337_v2 }
  0x6f   :  { %212 = vadd.xlane.f32.xlu1 %v211_v18 }
  0x70   :  { %209 = vadd.xlane.f32.xlu0 %v208_v19  ;;  %v993_v19 = vsub.s32 %v347_v6, %v337_v2 }
  0x73   :  { %218 = vadd.xlane.f32.xlu1 %v217_v24  ;;  %v995_v24 = vsub.s32 %v354_v9, %v337_v2 }
  0x74   :  { %215 = vadd.xlane.f32.xlu0 %v214_v25 }
  0x77   :  { %224 = vadd.xlane.f32.xlu1 %v223_v30 }
  0x78   :  { %221 = vadd.xlane.f32.xlu0 %v220_v31 }
  0xc8   :  { %v144_v42 = vpop.xlane.xlu1 %143 }
  0xc9   :  { %v132_v43 = vpop.xlane.xlu0 %131  ;;  %v231_v0 = vmul.f32 0.00390625, %v144_v42 }
  0xca   :  { %v227_v62 = vmul.f32 0.00390625, %v132_v43 }
  0xcc   :  { %v147_v44 = vpop.xlane.xlu1 %146 }
  0xcd   :  { %v135_v45 = vpop.xlane.xlu0 %134  ;;  %v232_v59 = vmul.f32 0.00390625, %v147_v44 }
  0xce   :  { %v228_v58 = vmul.f32 0.00390625, %v135_v45 }
  0xcf   :  { %v261_v5 = vpack.c.bf16 %v232_v59, %v231_v0 }
  0xd0   :  { %v141_v46 = vpop.xlane.xlu1 %140  ;;  %v259_v4 = vpack.c.bf16 %v228_v58, %v227_v62 }
  0xd1   :  { %v138_v47 = vpop.xlane.xlu0 %137  ;;  %v230_v60 = vmul.f32 0.00390625, %v141_v46  ;;  %v306_v17 = vunpack.c.l.b16 %v261_v5  ;;  %v307_v18 = vunpack.c.h.b16 %v261_v5 }
  0xd2   :  { %v229_v61 = vmul.f32 0.00390625, %v138_v47  ;;  %v302_v15 = vunpack.c.l.b16 %v259_v4  ;;  %v303_v16 = vunpack.c.h.b16 %v259_v4 }
  0xd3   :  { %v364_v33 = vrot.slane %v306_v17, %v989_v13  ;;  %v368_v34 = vrot.slane %v307_v18, %v991_v14 }
  0xd4   :  { %v153_v48 = vpop.xlane.xlu1 %152  ;;  %v260_v7 = vpack.c.bf16 %v230_v60, %v229_v61  ;;  %v339_v29 = vrot.slane %v302_v15, %v989_v13  ;;  %v344_v30 = vrot.slane %v303_v16, %v991_v14 }
  0xd5   :  { %v150_v49 = vpop.xlane.xlu0 %149  ;;  %v234_v10 = vmul.f32 0.00390625, %v153_v48  ;;  %v369_v44 = vsel %vm345_vm1, %v368_v34, %v364_v33 }
  0xd6   :  { %v233_v11 = vmul.f32 0.00390625, %v150_v49  ;;  %v304_v20 = vunpack.c.l.b16 %v260_v7  ;;  %v305_v35 = vunpack.c.h.b16 %v260_v7  ;;  %v346_v42 = vsel %vm345_vm1, %v344_v30, %v339_v29 }
  0xd8   :  { %v159_v50 = vpop.xlane.xlu1 %158  ;;  %v262_v25 = vpack.c.bf16 %v234_v10, %v233_v11  ;;  %v351_v36 = vrot.slane %v304_v20, %v993_v19  ;;  %v358_v46 = vrot.slane %v305_v35, %v995_v24 }
  0xd9   :  { %v156_v51 = vpop.xlane.xlu0 %155  ;;  %v236_v21 = vmul.f32 0.00390625, %v159_v50 }
  0xda   :  { %v235_v22 = vmul.f32 0.00390625, %v156_v51  ;;  %v308_v39 = vunpack.c.l.b16 %v262_v25  ;;  %v353_v45 = vsel %vm352_vm2, %v351_v36, %v346_v42  ;;  %v309_v47 = vunpack.c.h.b16 %v262_v25 }
  0xdb   :  { %v1011_v7 = vsel %vm359_vm3, %v358_v46, %v353_v45 }
  0xdc   :  { %v165_v52 = vpop.xlane.xlu1 %164  ;;  %v263_v37 = vpack.c.bf16 %v236_v21, %v235_v22  ;;  %v378_v4 = vrot.slane %v309_v47, %v995_v24 }
  0xdd   :  { %v162_v53 = vpop.xlane.xlu0 %161  ;;  %v238_v26 = vmul.f32 0.00390625, %v165_v52 }
  0xde   :  { %v237_v27 = vmul.f32 0.00390625, %v162_v53  ;;  %v310_v48 = vunpack.c.l.b16 %v263_v37  ;;  %v311_v49 = vunpack.c.h.b16 %v263_v37  ;;  %v373_v53 = vrot.slane %v308_v39, %v993_v19 }
  0xe0   :  { %v171_v55 = vpop.xlane.xlu1 %170  ;;  %v264_v40 = vpack.c.bf16 %v238_v26, %v237_v27 }
  0xe1   :  { %v168_v56 = vpop.xlane.xlu0 %167  ;;  %v240_v31 = vmul.f32 0.00390625, %v171_v55 }
  0xe2   :  { %v239_v32 = vmul.f32 0.00390625, %v168_v56  ;;  %v312_v54 = vunpack.c.l.b16 %v264_v40 }
  0xe4   :  { %v177_v63 = vpop.xlane.xlu1 %176  ;;  %v265_v43 = vpack.c.bf16 %v240_v31, %v239_v32  ;;  %v392_v15 = vrot.slane %v312_v54, %v993_v19 }
  0xe5   :  { %v174_v1 = vpop.xlane.xlu0 %173  ;;  %v242_v50 = vmul.f32 0.00390625, %v177_v63  ;;  %v383_v63 = vrot.slane %v310_v48, %v989_v13 }
  0xe6   :  { %v241_v51 = vmul.f32 0.00390625, %v174_v1  ;;  %v314_v58 = vunpack.c.l.b16 %v265_v43  ;;  %v315_v59 = vunpack.c.h.b16 %v265_v43  ;;  %v387_v1 = vrot.slane %v311_v49, %v991_v14 }
  0xe8   :  { %v183_v8 = vpop.xlane.xlu1 %182  ;;  %v266_v5 = vpack.c.bf16 %v242_v50, %v241_v51  ;;  %v402_v18 = vrot.slane %v314_v58, %v989_v13  ;;  %v406_v20 = vrot.slane %v315_v59, %v991_v14  ;;  %v388_v25 = vsel %vm345_vm1, %v387_v1, %v383_v63 }
  0xe9   :  { %v180_v12 = vpop.xlane.xlu0 %179  ;;  %v244_v55 = vmul.f32 0.00390625, %v183_v8  ;;  %v374_v8 = vsel %vm352_vm2, %v373_v53, %v369_v44  ;;  %v393_v34 = vsel %vm352_vm2, %v392_v15, %v388_v25 }
  0xea   :  { %v243_v56 = vmul.f32 0.00390625, %v180_v12  ;;  %v313_v12 = vunpack.c.h.b16 %v264_v40  ;;  %v316_v26 = vunpack.c.l.b16 %v266_v5  ;;  %v317_v29 = vunpack.c.h.b16 %v266_v5 }
  0xec   :  { %v189_v23 = vpop.xlane.xlu1 %188  ;;  %v267_v9 = vpack.c.bf16 %v244_v55, %v243_v56  ;;  %v397_v35 = vrot.slane %v313_v12, %v995_v24  ;;  %v411_v42 = vrot.slane %v316_v26, %v993_v19  ;;  %v416_v47 = vrot.slane %v317_v29, %v995_v24 }
  0xed   :  { %v186_v28 = vpop.xlane.xlu0 %185  ;;  %v246_v60 = vmul.f32 0.00390625, %v189_v23  ;;  %v1018_v23 = vsel %vm359_vm3, %v378_v4, %v374_v8 }
  0xee   :  { %v245_v61 = vmul.f32 0.00390625, %v186_v28  ;;  %v318_v30 = vunpack.c.l.b16 %v267_v9  ;;  %v319_v31 = vunpack.c.h.b16 %v267_v9 }
  0xf0   :  { %v195_v38 = vpop.xlane.xlu1 %194  ;;  %v268_v16 = vpack.c.bf16 %v246_v60, %v245_v61  ;;  %v421_v48 = vrot.slane %v318_v30, %v989_v13  ;;  %v425_v49 = vrot.slane %v319_v31, %v991_v14 }
  0xf1   :  { %v192_v41 = vpop.xlane.xlu0 %191  ;;  %v248_v62 = vmul.f32 0.00390625, %v195_v38  ;;  %v407_v38 = vsel %vm345_vm1, %v406_v20, %v402_v18 }
  0xf2   :  { %v247_v0 = vmul.f32 0.00390625, %v192_v41  ;;  %v320_v36 = vunpack.c.l.b16 %v268_v16  ;;  %v426_v4 = vsel %vm345_vm1, %v425_v49, %v421_v48 }
  0xf4   :  { %v201_v52 = vpop.xlane.xlu1 %200  ;;  %v269_v21 = vpack.c.bf16 %v248_v62, %v247_v0  ;;  %v430_v53 = vrot.slane %v320_v36, %v993_v19 }
  0xf5   :  { %v198_v57 = vpop.xlane.xlu0 %197  ;;  %v250_v2 = vmul.f32 0.00390625, %v201_v52  ;;  %v321_v52 = vunpack.c.h.b16 %v268_v16 }
  0xf6   :  { %v249_v3 = vmul.f32 0.00390625, %v198_v57  ;;  %v322_v39 = vunpack.c.l.b16 %v269_v21  ;;  %v323_v40 = vunpack.c.h.b16 %v269_v21  ;;  %v431_v12 = vsel %vm352_vm2, %v430_v53, %v426_v4 }
  0xf8   :  { %v207_v6 = vpop.xlane.xlu1 %206  ;;  %v270_v22 = vpack.c.bf16 %v250_v2, %v249_v3  ;;  %v440_v56 = vrot.slane %v322_v39, %v989_v13  ;;  %v444_v57 = vrot.slane %v323_v40, %v991_v14  ;;  %v412_v3 = vsel %vm352_vm2, %v411_v42, %v407_v38  ;;  %v782_v42 = vld [vmem:[#allocation7 + $0x38] sm:$0xff]  }
  0xf9   :  { %v252_v10 = vmul.f32 0.00390625, %v207_v6  ;;  %v204_v11 = vpop.xlane.xlu0 %203  ;;  %v435_v6 = vrot.slane %v321_v52, %v995_v24  ;;  %757 = vmatpush3.bf16.msra.mxu1 %v782_v42 }
  0xfa   :  { %v251_v17 = vmul.f32 0.00390625, %v204_v11  ;;  %v324_v41 = vunpack.c.l.b16 %v270_v22  ;;  %v325_v58 = vunpack.c.h.b16 %v270_v22  ;;  %v398_v11 = vsel %vm359_vm3, %v397_v35, %v393_v34 }
  0xfb   :  { %v445_v15 = vsel %vm345_vm1, %v444_v57, %v440_v56  ;;  %v417_v22 = vsel %vm359_vm3, %v416_v47, %v412_v3  ;;  %v436_v29 = vsel %vm359_vm3, %v435_v6, %v431_v12 }
  0xfc   :  { %v271_v27 = vpack.c.bf16 %v252_v10, %v251_v17  ;;  %v213_v28 = vpop.xlane.xlu1 %212  ;;  %v449_v59 = vrot.slane %v324_v41, %v993_v19  ;;  %v454_v16 = vrot.slane %v325_v58, %v995_v24 }
  0xfd   :  { %v254_v32 = vmul.f32 0.00390625, %v213_v28  ;;  %v210_v33 = vpop.xlane.xlu0 %209  ;;  %v495_v28 = vsel %vm494_vm4, %v1018_v23, %v1011_v7 }
  0xfe   :  { %v253_v37 = vmul.f32 0.00390625, %v210_v33  ;;  %v326_v43 = vunpack.c.l.b16 %v271_v27  ;;  %v327_v44 = vunpack.c.h.b16 %v271_v27  ;;  %v450_v17 = vsel %vm352_vm2, %v449_v59, %v445_v15 }
  0xff   :  { %v455_v33 = vsel %vm359_vm3, %v454_v16, %v450_v17 }
 0x100   :  { %v272_v45 = vpack.c.bf16 %v254_v32, %v253_v37  ;;  %v219_v46 = vpop.xlane.xlu1 %218  ;;  %v459_v60 = vrot.slane %v326_v43, %v989_v13  ;;  %v463_v61 = vrot.slane %v327_v44, %v991_v14  ;;  %v497_v32 = vsel %vm496_vm5, %v398_v11, %v495_v28 }
 0x101   :  { %v256_v50 = vmul.f32 0.00390625, %v219_v46  ;;  %v216_v51 = vpop.xlane.xlu0 %215  ;;  %v499_v34 = vsel %vm498_vm6, %v417_v22, %v497_v32 }
 0x102   :  { %v328_v54 = vunpack.c.l.b16 %v272_v45  ;;  %v255_v55 = vmul.f32 0.00390625, %v216_v51  ;;  %v329_v62 = vunpack.c.h.b16 %v272_v45  ;;  %v464_v18 = vsel %vm345_vm1, %v463_v61, %v459_v60 }
 0x103   :  { %v501_v7 = vsel %vm500_vm7, %v436_v29, %v499_v34 }
 0x104   :  { %v273_v0 = vpack.c.bf16 %v256_v50, %v255_v55  ;;  %v225_v2 = vpop.xlane.xlu1 %224  ;;  %v468_v63 = vrot.slane %v328_v54, %v993_v19  ;;  %v473_v20 = vrot.slane %v329_v62, %v995_v24  ;;  %v503_v37 = vsel %vm502_vm8, %v455_v33, %v501_v7 }
 0x105   :  { %v258_v1 = vmul.f32 0.00390625, %v225_v2  ;;  %v222_v5 = vpop.xlane.xlu0 %221 }
 0x106   :  { %v330_v8 = vunpack.c.l.b16 %v273_v0  ;;  %v331_v9 = vunpack.c.h.b16 %v273_v0  ;;  %v257_v10 = vmul.f32 0.00390625, %v222_v5  ;;  %v469_v25 = vsel %vm352_vm2, %v468_v63, %v464_v18 }
 0x108   :  { %v274_v21 = vpack.c.bf16 %v258_v1, %v257_v10  ;;  %v478_v26 = vrot.slane %v330_v8, %v989_v13  ;;  %v482_v27 = vrot.slane %v331_v9, %v991_v14  ;;  %v474_v13 = vsel %vm359_vm3, %v473_v20, %v469_v25 }
 0x109   :  { %v505_v39 = vsel %vm504_vm9, %v474_v13, %v503_v37 }
 0x10a   :  { %v332_v30 = vunpack.c.l.b16 %v274_v21  ;;  %v333_v31 = vunpack.c.h.b16 %v274_v21  ;;  %v483_v23 = vsel %vm345_vm1, %v482_v27, %v478_v26 }
 0x10c   :  { %v487_v14 = vrot.slane %v332_v30, %v993_v19  ;;  %v492_v35 = vrot.slane %v333_v31, %v995_v24  ;;  %v709_v19 = vld [vmem:[%s1095_s2] ss:$0 sm:$0xff] }
 0x10e   :  { %v488_v36 = vsel %vm352_vm2, %v487_v14, %v483_v23 }
 0x10f   :  { %v493_v38 = vsel %vm359_vm3, %v492_v35, %v488_v36 }
 0x110   :  { %v507_v40 = vsel %vm506_vm10, %v493_v38, %v505_v39 }
 0x111   :  { %v508_v41 = vpack.c.b16 %v507_v40, %v507_v40 }
 0x113   :  { %739 = vmatmul.mubr.msk.bf16.vlgmr.msra.gmra.mrb[0].mxu0 %vm521_vm11, %v508_v41 }
 0x1e6   :  { %v559_v24 = vpop.f32.mrb[0].mxu0 }
 0x1e7   :  { %v560_v43 = vadd.f32 %v709_v19, %v559_v24  ;;  %v740_v44 = vpop.f32.mrb[1].mxu0 }
 0x1e8   :  { %v562_v45 = vpop.f32.mrb[2].mxu0 }
 0x1e9   :  { %v565_v46 = vpack.c.bf16 %v560_v43, %v560_v43  ;;  %677 = vst [vmem:[#allocation9] sm:$0xff] %v560_v43  ;;  %v741_v47 = vpop.f32.mrb[3].mxu0 }
 0x1eb   :  { %759 = vmatmul.mubr.bf16.vlgmr.msra.gmra.mrb[0].mxu1 %v565_v46 }
 0x1ec   :  { %860 = shalt.err (!%p857_p0)
}
 0x1ed   :  { %s861_s16 = scalar_lea.hbm %s1099_s6, 128 }
 0x1ee   :  { %p862_p1 = scmp.ne.s32.totalorder %s1099_s6, %s861_s16  ;;  %p865_p2 = scmp.lt.u32.totalorder %s861_s16, %s1099_s6 }
 0x1f0   :  { %p867_p3 = pnand %p865_p2, %p862_p1 }
 0x1f2   :  { %870 = shalt.err (!%p867_p3)
}
 0x1f3   :  { %698 = dma.vmem_to_hbm [thread:$0]  %s696_s13, 128, %s1099_s6, [#allocation10]   ;;  %v713_v48 = vld [vmem:[%s1097_s4] ss:$0 sm:$0xff] }
 0x1f4   :  { %s911_s24 = smov [#allocation8]  }
 0x1f5   :  { %s685_s25 = sshll.u32 %s911_s24, 4  ;;  %s686_s25 = int_to_ptr.vmem [resolvable:$true] %s685_s25 }
 0x1f6   :  { %s871_s26 = scalar_lea.vmem %s686_s25, 128  ;;  %p876_p5 = scmp.lt.s32.totalorder %s686_s25, %s686_s25 }
 0x1f7   :  { %p872_p4 = scmp.ne.s32.totalorder %s686_s25, %s871_s26  ;;  %p877_p6 = scmp.lt.s32.totalorder %s871_s26, %s871_s26 }
 0x1f9   :  { %p878_p7 = por %p877_p6, %p876_p5 }
 0x1fb   :  { %p879_p8 = pnand %p878_p7, %p872_p4 }
 0x2be   :  { %v671_v49 = vpop.f32.mrb[0].mxu1 }
 0x2bf   :  { %v672_v50 = vadd.f32 %v713_v48, %v671_v49  ;;  %v760_v51 = vpop.f32.mrb[1].mxu1 }
 0x2c0   :  { %v674_v52 = vpop.f32.mrb[2].mxu1 }
 0x2c1   :  { %678 = vst [vmem:[#allocation8] sm:$0xff] %v672_v50  ;;  %v761_v53 = vpop.f32.mrb[3].mxu1 }
 0x2c2   :  { %882 = shalt.err (!%p879_p8)
}
 0x2c3   :  { %s883_s4 = scalar_lea.hbm %s1098_s5, 128 }
 0x2c4   :  { %p884_p9 = scmp.ne.s32.totalorder %s1098_s5, %s883_s4  ;;  %p887_p10 = scmp.lt.u32.totalorder %s883_s4, %s1098_s5 }
 0x2c6   :  { %p889_p11 = pnand %p887_p10, %p884_p9 }
 0x2c8   :  { %892 = shalt.err (!%p889_p11)
}
 0x2c9   :  { %688 = dma.vmem_to_hbm [thread:$0]  %s686_s25, 128, %s1098_s5, [#allocation4]  }
 0x2ca   :  { %897 = dma.done.wait [#allocation4], 128  }
 0x2cb   :  { %898 = vsyncadd [#allocation4], 4294967168 }
 0x2cc   :  { %899 = dma.done.wait [#allocation10], 128  }
 0x2cd   :  { %900 = vsyncadd [#allocation10], 4294967168 }
 0x2ce   :  { %705 = vsyncpa [#allocation3], 1 }
 0x2cf   :  { %706 = vsyncpa [#allocation6], 1 }
 0x2d0   :  { %707 = vsyncpa [#allocation4], 1 }
 0x2d1   :  { %708 = vsyncpa [#allocation10], 1 }

</bundles_post_ra>
